<compile_context>
chip_gen: v5e
topology: v5e:2x2
jax: 0.10.0
libtpu: 0.0.40
codegen_flags: <defaults>
</compile_context>

<pallas_src>
import functools

import jax
import jax.numpy as jnp
from jax.experimental import pallas as pl
from jax.experimental.pallas import tpu as pltpu


def _round_up(x, m):
    return ((x + m - 1) // m) * m


def _aggregate_kernel(idx_ref, sent_ref, tab_ref, out_ref, *,
                      num_cols, vocab_pad, sent_dim):
    """One batch tile.

    idx_ref:  (TN, C)       int32 categorical ids
    sent_ref: (TN, D)       sentence embeddings (pure passthrough)
    tab_ref:  (C, Vpad, D)  fused tables (table_c * w_c) @ W_c^T, bias folded in
    out_ref:  (TN, 2D)      [sentence | projected categorical]
    """
    tn = sent_ref.shape[0]
    idx = idx_ref[...]                                            # (TN, C) int32
    # 2-D iota, hoisted out of the (tiny, static) column loop.
    lane_ids = jax.lax.broadcasted_iota(jnp.int32, (tn, vocab_pad), 1)

    acc = jnp.zeros((tn, sent_dim), jnp.float32)
    for c in range(num_cols):                                     # static unroll, C is tiny
        one_hot = (idx[:, c:c + 1] == lane_ids).astype(tab_ref.dtype)   # (TN, Vpad)
        acc += jnp.dot(one_hot, tab_ref[c],                       # gather+project on MXU
                       preferred_element_type=jnp.float32)

    out_ref[:, :sent_dim] = sent_ref[...].astype(out_ref.dtype)
    out_ref[:, sent_dim:] = acc.astype(out_ref.dtype)


def fold_parameters(embedding_tables, proj_weight, proj_bias, categorical_weights,
                    categorical_columns, categorical_embed_dim, *,
                    table_dtype=jnp.float32):
    """One-time parameter fold (done in f32).

    fused_c = (table_c * w_c) @ W_c^T  with the Linear bias folded into column 0.

    embedding_tables: dict col -> (vocab_c, E)
    proj_weight:      (D, C*E)  nn.Linear weight (out_features, in_features)
    proj_bias:        (D,)
    Returns (C, Vpad, D) stacked fused tables, vocab padded to a common 8-aligned size.
    """
    d = proj_weight.shape[0]
    e = categorical_embed_dim
    vpad = _round_up(max(embedding_tables[c].shape[0] for c in categorical_columns), 8)
    fused = []
    for c, col in enumerate(categorical_columns):
        tbl = embedding_tables[col].astype(jnp.float32)                     # (vocab_c, E)
        w_t = proj_weight[:, c * e:(c + 1) * e].T.astype(jnp.float32)       # (E, D)
        f = (tbl * jnp.float32(categorical_weights[col])) @ w_t             # (vocab_c, D)
        if c == 0:
            f = f + proj_bias.reshape(1, d).astype(jnp.float32)
        f = jnp.pad(f, ((0, vpad - f.shape[0]), (0, 0)))
        fused.append(f)
    return jnp.stack(fused, axis=0).astype(table_dtype)                     # (C, Vpad, D)


def feature_aggregator_simple(sentence_embeddings, categorical_indices, fused_tables, *,
                              tile_n=1024, vmem_cap_bytes=48 * 1024 * 1024):
    """Forward pass of FeatureAggregatorSimple.

    sentence_embeddings: (N, D)
    categorical_indices: (N, C) int32
    fused_tables:        (C, Vpad, D) from fold_parameters
    returns:             (N, 2*D) = [sentence | projected_categorical]
    """
    n, d = sentence_embeddings.shape
    c, vpad, d2 = fused_tables.shape
    assert d2 == d
    assert categorical_indices.shape == (n, c)
    idx = categorical_indices.astype(jnp.int32)
    out_dtype = sentence_embeddings.dtype
    item = jnp.dtype(out_dtype).itemsize
    tab_item = jnp.dtype(fused_tables.dtype).itemsize

    # --- batch tiling --------------------------------------------------------
    if n < 16:
        tn = n                                    # single tiny tile (equals full dim)
    elif n <= 2 * tile_n:
        # Two tiles so both v7x TensorCores get work; 8-row (f32 sublane)
        # alignment, promoted to 128-row MXU granules once the batch is big.
        align = 128 if n >= 256 else 8
        tn = _round_up(pl.cdiv(n, 2), align)
    else:
        tn = _round_up(min(tile_n, n), 128)
    grid_n = pl.cdiv(n, tn)

    # --- VMEM budget ---------------------------------------------------------
    # Double-buffered streamed tiles (ids, sentence, output) + resident tables,
    # with 2x headroom.  Cap at 48 MiB so v7x (64 MiB per TC) keeps headroom for
    # Mosaic internal scratch; small safety floor well under the compiler default.
    stream_bytes = 2 * tn * (c * 4 + d * item + 2 * d * item)
    resident_bytes = 2 * c * vpad * d * tab_item
    vmem_limit = int(min(vmem_cap_bytes,
                         max(16 * 1024 * 1024, 2 * (stream_bytes + resident_bytes))))

    cost = pl.CostEstimate(
        flops=2 * n * c * vpad * d,
        transcendentals=0,
        bytes_accessed=(n * c * 4 + n * d * item
                        + c * vpad * d * tab_item + n * 2 * d * item),
    )

    kernel = functools.partial(_aggregate_kernel, num_cols=c, vocab_pad=vpad, sent_dim=d)

    return pl.pallas_call(
        kernel,
        out_shape=jax.ShapeDtypeStruct((n, 2 * d), out_dtype),
        grid=(grid_n,),
        in_specs=[
            pl.BlockSpec((tn, c), lambda i: (i, 0)),           # streamed int32 ids
            pl.BlockSpec((tn, d), lambda i: (i, 0)),           # streamed sentence tile
            pl.BlockSpec((c, vpad, d), lambda i: (0, 0, 0)),   # VMEM-resident fused tables
        ],
        out_specs=pl.BlockSpec((tn, 2 * d), lambda i: (i, 0)),
        compiler_params=pltpu.CompilerParams(
            dimension_semantics=("parallel",),
            vmem_limit_bytes=vmem_limit,
        ),
        cost_estimate=cost,
    )(idx, sentence_embeddings, fused_tables)


if __name__ == "__main__":
    # Small synthetic configuration matching the module's defaults.
    N = 16
    sentence_dim = 32
    categorical_columns = ["col_a", "col_b"]
    categorical_dims = {"col_a": 10, "col_b": 7}
    categorical_embed_dim = 64
    C = len(categorical_columns)
    CE = C * categorical_embed_dim

    key = jax.random.PRNGKey(0)
    keys = jax.random.split(key, 6)

    def xavier_uniform(k, shape, dtype=jnp.float32):
        fan_out, fan_in = shape
        limit = (6.0 / (fan_in + fan_out)) ** 0.5
        return jax.random.uniform(k, shape, dtype=dtype, minval=-limit, maxval=limit)

    # Deterministic parameter init (same shapes as the PyTorch module).
    embedding_tables = {}
    for i, col in enumerate(categorical_columns):
        embedding_tables[col] = xavier_uniform(
            keys[i], (categorical_dims[col], categorical_embed_dim))
    proj_w = xavier_uniform(keys[2], (sentence_dim, CE))     # nn.Linear weight (out, in)
    proj_b = jnp.zeros((sentence_dim,), dtype=jnp.float32)   # zero bias

    # Per-column scalar weights (exercises set_categorical_weights semantics).
    categorical_weights = {"col_a": 1.0, "col_b": 0.75}

    # One-time parameter fold -> tiny VMEM-resident fused tables.
    fused_tables = fold_parameters(embedding_tables, proj_w, proj_b,
                                   categorical_weights, categorical_columns,
                                   categorical_embed_dim)

    # Example inputs.
    sentence_embeddings = jax.random.normal(keys[3], (N, sentence_dim), jnp.float32)
    categorical_data = {
        "col_a": jax.random.randint(keys[4], (N,), 0, categorical_dims["col_a"]),
        "col_b": jax.random.randint(keys[5], (N,), 0, categorical_dims["col_b"]),
    }
    cat_indices = jnp.stack([categorical_data[col] for col in categorical_columns],
                            axis=1).astype(jnp.int32)        # (N, C)

    out = feature_aggregator_simple(sentence_embeddings, cat_indices, fused_tables)
    jax.block_until_ready(out)

    # Pure-JAX reference following the original module math exactly
    # (gather -> scale -> concat -> Linear -> concat with sentence).
    embedded = [embedding_tables[col][categorical_data[col]] * categorical_weights[col]
                for col in categorical_columns]
    cat_concat = jnp.concatenate(embedded, axis=1)            # (N, C*E)
    ref_proj = cat_concat @ proj_w.T + proj_b
    ref = jnp.concatenate([sentence_embeddings, ref_proj], axis=1)

    assert out.shape == (N, 2 * sentence_dim)
    assert jnp.allclose(out, ref, atol=1e-4, rtol=1e-4), float(jnp.max(jnp.abs(out - ref)))

    print("KERNEL_OK")
</pallas_src>

<mosaic_0001>
module attributes {stable_mosaic.version = 11 : i64} {
  func.func @_aggregate_kernel(%arg0: i32, %arg1: memref<8x2xi32, #tpu.memory_space<vmem>>, %arg2: memref<8x32xf32, #tpu.memory_space<vmem>>, %arg3: memref<2x16x32xf32, #tpu.memory_space<vmem>>, %arg4: memref<8x64xf32, #tpu.memory_space<vmem>>) attributes {dimension_semantics = [#tpu.dimension_semantics<parallel>], iteration_bounds = array<i64: 2>, scalar_prefetch = 0 : i64, scratch_operands = 0 : i64, tpu.core_type = #tpu.core_type<tc>, window_params = [{transform_indices = @transform_0, window_bounds = array<i64: 8, 2>}, {transform_indices = @transform_1, window_bounds = array<i64: 8, 32>}, {pipeline_mode = #tpu.pipeline_mode<synchronous>, transform_indices = @transform_2, window_bounds = array<i64: 2, 16, 32>}, {transform_indices = @transform_3, window_bounds = array<i64: 8, 64>}]} {
    %c0 = arith.constant 0 : index
    %c0_0 = arith.constant 0 : index
    %0 = vector.load %arg1[%c0, %c0_0] : memref<8x2xi32, #tpu.memory_space<vmem>>, vector<8x2xi32>
    %1 = tpu.iota {dimensions = array<i32: 1>} : vector<8x16xi32>
    %cst = arith.constant 0.000000e+00 : f32
    %2 = vector.broadcast %cst : f32 to vector<8x32xf32>
    %3 = vector.extract_strided_slice %0 {offsets = [0, 0], sizes = [8, 1], strides = [1, 1]} : vector<8x2xi32> to vector<8x1xi32>
    %4 = vector.broadcast %3 : vector<8x1xi32> to vector<8x16xi32>
    %5 = arith.cmpi eq, %4, %1 : vector<8x16xi32>
    %6 = arith.extui %5 : vector<8x16xi1> to vector<8x16xi32>
    %7 = arith.sitofp %6 : vector<8x16xi32> to vector<8x16xf32>
    %c0_1 = arith.constant 0 : index
    %c0_2 = arith.constant 0 : index
    %c0_3 = arith.constant 0 : index
    %8 = vector.load %arg3[%c0_1, %c0_2, %c0_3] : memref<2x16x32xf32, #tpu.memory_space<vmem>>, vector<1x16x32xf32>
    %9 = vector.shape_cast %8 : vector<1x16x32xf32> to vector<16x32xf32>
    %cst_4 = arith.constant dense<0.000000e+00> : vector<8x32xf32>
    %10 = tpu.matmul %7, %9, %cst_4 {dimension_numbers = #tpu.dot_dimension_numbers<[1], [0], [0], [1], [0, 0, 1, 1], [], []>} : vector<8x16xf32>, vector<16x32xf32>, vector<8x32xf32> -> vector<8x32xf32>
    %11 = arith.addf %2, %10 : vector<8x32xf32>
    %12 = vector.extract_strided_slice %0 {offsets = [0, 1], sizes = [8, 1], strides = [1, 1]} : vector<8x2xi32> to vector<8x1xi32>
    %13 = vector.broadcast %12 : vector<8x1xi32> to vector<8x16xi32>
    %14 = arith.cmpi eq, %13, %1 : vector<8x16xi32>
    %15 = arith.extui %14 : vector<8x16xi1> to vector<8x16xi32>
    %16 = arith.sitofp %15 : vector<8x16xi32> to vector<8x16xf32>
    %c1 = arith.constant 1 : index
    %c0_5 = arith.constant 0 : index
    %c0_6 = arith.constant 0 : index
    %17 = vector.load %arg3[%c1, %c0_5, %c0_6] : memref<2x16x32xf32, #tpu.memory_space<vmem>>, vector<1x16x32xf32>
    %18 = vector.shape_cast %17 : vector<1x16x32xf32> to vector<16x32xf32>
    %cst_7 = arith.constant dense<0.000000e+00> : vector<8x32xf32>
    %19 = tpu.matmul %16, %18, %cst_7 {dimension_numbers = #tpu.dot_dimension_numbers<[1], [0], [0], [1], [0, 0, 1, 1], [], []>} : vector<8x16xf32>, vector<16x32xf32>, vector<8x32xf32> -> vector<8x32xf32>
    %20 = arith.addf %11, %19 : vector<8x32xf32>
    %c0_8 = arith.constant 0 : index
    %c0_9 = arith.constant 0 : index
    %21 = vector.load %arg2[%c0_8, %c0_9] : memref<8x32xf32, #tpu.memory_space<vmem>>, vector<8x32xf32>
    %c0_10 = arith.constant 0 : index
    %c0_11 = arith.constant 0 : index
    %22 = vector.load %arg4[%c0_10, %c0_11] : memref<8x64xf32, #tpu.memory_space<vmem>>, vector<8x32xf32>
    tpu.vector_store %arg4[%c0_10, %c0_11], %21 {strides = array<i32>} : memref<8x64xf32, #tpu.memory_space<vmem>>, vector<8x32xf32>,
    %c0_12 = arith.constant 0 : index
    %c32 = arith.constant 32 : index
    %23 = vector.load %arg4[%c0_12, %c32] : memref<8x64xf32, #tpu.memory_space<vmem>>, vector<8x32xf32>
    tpu.vector_store %arg4[%c0_12, %c32], %20 {strides = array<i32>} : memref<8x64xf32, #tpu.memory_space<vmem>>, vector<8x32xf32>,
    return
  }
  func.func @transform_0(%arg0: i32) -> (i32, i32) {
    %c0_i32 = arith.constant 0 : i32
    %c0_i32_0 = arith.constant 0 : i32
    return %arg0, %c0_i32 : i32, i32
  }
  func.func @transform_1(%arg0: i32) -> (i32, i32) {
    %c0_i32 = arith.constant 0 : i32
    %c0_i32_0 = arith.constant 0 : i32
    return %arg0, %c0_i32 : i32, i32
  }
  func.func @transform_2(%arg0: i32) -> (i32, i32, i32) {
    %c0_i32 = arith.constant 0 : i32
    %c0_i32_0 = arith.constant 0 : i32
    %c0_i32_1 = arith.constant 0 : i32
    %c0_i32_2 = arith.constant 0 : i32
    return %c0_i32, %c0_i32_0, %c0_i32_1 : i32, i32, i32
  }
  func.func @transform_3(%arg0: i32) -> (i32, i32) {
    %c0_i32 = arith.constant 0 : i32
    %c0_i32_0 = arith.constant 0 : i32
    return %arg0, %c0_i32 : i32, i32
  }
}

</mosaic_0001>

<bundles_post_ra>
// kernel: tpu_custom_call.1
= control target key start
LH: loop header
LB: loop body
LE: loop exit
PB: predicated region body
PF: predicated region fallthrough
CT: control target
= control target key end

     0   :  { %8 = vsyncpa [#allocation3], 0  ;;  %s680_s0 = inlined_call_operand.vmem [shape: s32[16,2], index: 0, kind: input, shape index: {}]   ;;  %s681_s1 = inlined_call_operand.vmem [shape: f32[16,32], index: 1, kind: input, shape index: {}]   ;;  %s682_s2 = inlined_call_operand.hbm [shape: f32[2,16,32], index: 2, kind: input, shape index: {}]   ;;  %s683_s3 = inlined_call_operand.hbm [shape: f32[16,64], index: 3, kind: output, shape index: {}]  }
   0x1   :  { %9 = vsyncpa [#allocation4], 0 }
   0x2   :  { %11 = vsyncpa [#allocation4 + $0x1], 0  ;;  %s575_s12 = smov 0   ;;  %s577_s13 = smov 0  }
   0x3   :  { %s579_s14 = smov 0   ;;  %s581_s15 = smov 0  }
   0x4 LB: > { %s596_s16 = sadd.s32 4294967295, %s546_s15   ;;  %s375_s17 = sadd.s32 4294967294, %s546_s15   ;;  %s546_s15 = sphi %s581_s15, %s689_s15   ;;  %s542_s14 = sphi %s579_s14, %s688_s14   ;;  %s538_s13 = sphi %s577_s13, %s687_s13   ;;  %s534_s12 = sphi %s575_s12, %s686_s12  }
   0x5   : > { %s600_s18 = sadd.s32 1, %s546_s15   ;;  %s97_s19 = sadd.s32 1, %s542_s14 }
   0x6   : > { %s94_s20 = ssub.s32 %s546_s15, %s600_s18  ;;  %p107_p0 = scmp.ne.s32.totalorder %s542_s14, %s538_s13 }
   0x7   : > { %p95_p1 = scmp.eq.s32.totalorder %s94_s20, 0  ;;  %p108_p2 = scmp.eq.s32.totalorder %s596_s16, 1 }
   0x8   : > { %p113_p3 = scmp.ne.s32.totalorder %s538_s13, %s534_s12  ;;  %p114_p4 = scmp.eq.s32.totalorder %s375_s17, 1 }
   0x9   : > { %s611_s21 = scalar_select %p95_p1, %s542_s14, %s97_s19  }
   0xa   : > { %p613_p5 = por %p108_p2, %p107_p0  ;;  %p617_p6 = por %p114_p4, %p113_p3 }
   0xb   : > { %p376_p7 = scmp.ge.s32.totalorder %s546_s15, 1  ;;  %p121_p8 = scmp.lt.s32.totalorder %s546_s15, 3 }
   0xc   : > { %p406_p9 = scmp.eq.s32.totalorder %s596_s16, 0  ;;  %s132_s26 = sshll.u32 %s682_s2, 4  ;;  %s133_s26 = int_to_ptr.hbm [resolvable:$true] %s132_s26 }
   0xd   : > { %p122_p10 = pnand %p376_p7, %p121_p8  ;;  %s548_s27 = smov [#allocation2]  }
   0xe   : > { %s134_s28 = sshll.u32 %s548_s27, 4  ;;  %s549_s29 = smov 128   ;;  %s135_s28 = int_to_ptr.vmem [resolvable:$true] %s134_s28 }
   0xf   : > { %p398_p11 = pneg %p122_p10  ;;  %s550_s30 = smov 8  }
  0x10   : > { %164 = sbr.rel (%p122_p10) target bundleno = 401 (0x191), region = 32 }
  0x11   : > { %p399_p12 = pnand %p406_p9, %p398_p11 }
  0x13   : > { %401 = dma.hbm_to_vmem [thread:$0]  (!%p399_p12), %s133_s26, 512, %s135_s28, [#allocation3], %s549_s29, %s549_s29, %s550_s30  }
  0x15   : > { %525 = dma.done.wait (%p406_p9), [#allocation3], 512  }
  0x16   : > { %527 = vsyncadd (%p406_p9), [#allocation3], 4294966784  ;;  %p192_p13 = scmp.lt.s32.totalorder %s596_s16, 1  ;;  %v551_v0 = vmov 0   ;;  %v210_v2 = vld [vmem:[#allocation2 + $0x8] sm:$0xff]  ;;  %v552_v3 = vmov 1   ;;  %v201_v7 = vlaneseq }
  0x17   : > { %448 = vset.pattern.permute.xlu0 %v551_v0  ;;  %261 = vmatpush.msra.mxu1 %v210_v2  ;;  %v209_v4 = vld [vmem:[#allocation2] sm:$0xff]  ;;  %v219_v5 = vld [vmem:[#allocation2 + $0x18] sm:$0xff]  ;;  %v218_v6 = vld [vmem:[#allocation2 + $0x10] sm:$0xff]  ;;  %vm220_vm0 = vcmask 130048   ;;  %v553_v10 = vmov 0.0   ;;  %s554_s9 = smov 32  }
  0x18   : > { %s635_s4 = scalar_select %p192_p13, %s596_s16, 1  ;;  %238 = vmatpush.msra.mxu0 %v219_v5  ;;  %v202_v8 = vand.u32 127, %v201_v7  ;;  %vm268_vm3 = vcmask 261120   ;;  %vm274_vm4 = vcmask 523520  }
  0x19   : > { %262 = vmatpush.msra.mxu1 %v209_v4  ;;  %s189_s10 = sand.u32 1, %s538_s13   ;;  %s389_s25 = sshll.u32 %s596_s16, 3 }
  0x1a   : > { %s382_s5 = sshll.u32 %s635_s4, 3  ;;  %239 = vmatpush.msra.mxu0 %v218_v6  ;;  %s381_s20 = sshll.u32 %s189_s10, 3 }
  0x1b   : > { %s195_s8 = scalar_lea.vmem %s680_s0, %s382_s5  ;;  %s199_s19 = scalar_lea.vmem %s681_s1, %s382_s5 }
  0x1c   : > { %v200_v1 = vld [vmem:[%s195_s8] sm:$0xff]  ;;  %s191_s24 = scalar_lea.vmem [#allocation5], %s381_s20  ;;  %s287_s28 = scalar_lea.hbm %s683_s3, %s389_s25 }
  0x1d   : > { %204 = vperm.xlu0 %448, %v200_v1   ;;  %v267_v17 = vld [vmem:[%s199_s19] sm:$0xff]  ;;  %s289_s29 = sshll.u32 %s191_s24, 4  ;;  %s291_s30 = sshll.u32 %s287_s28, 4  ;;  %s290_s29 = int_to_ptr.vmem [resolvable:$true] %s289_s29  ;;  %s292_s30 = int_to_ptr.hbm [resolvable:$true] %s291_s30 }
  0x1e   : > { %269 = vst.msk [vmem:[%s191_s24] sm:$0xff] %vm268_vm3, %v267_v17  ;;  %s277_s4 = scalar_lea.sflag [#allocation4], %s189_s10  ;;  %s494_s5 = sshra.s32 %s292_s30, 4  ;;  %s495_s5 = int_to_ptr.hbm [resolvable:$true] %s494_s5 }
  0x1f   : > { %s496_s6 = scalar_lea.hbm %s495_s5, 8  ;;  %s500_s8 = scalar_lea.hbm %s683_s3, 16 }
  0x20   : > { %p497_p0 = scmp.ne.s32.totalorder %s495_s5, %s496_s6  ;;  %p501_p3 = scmp.lt.s32.totalorder %s495_s5, %s683_s3 }
  0x21   : > { %p502_p4 = scmp.lt.s32.totalorder %s500_s8, %s496_s6 }
  0x22   : > { %p498_p1 = pnand %p497_p0, %p613_p5 }
  0x23   : > { %p503_p7 = por %p502_p4, %p501_p3 }
  0x24   : > { %p499_p2 = pneg %p498_p1 }
  0x25   : > { %449 = vset.pattern.permute.xlu0 %v552_v3 }
  0x26   : > { %212 = vperm.xlu0 %449, %v200_v1   ;;  %p504_p8 = pnand %p503_p7, %p499_p2 }
  0x8f   : > { %v205_v9 = vpop.permute.xlu0 %204 }
  0x90   : > { %vm206_vm1 = vcmp.eq.s32.totalorder %v205_v9, %v202_v8 }
  0x91   : > { %v384_v11 = vsel %vm206_vm1, 1.0, %v553_v10 }
  0x92   : > { %387 = vmatmul.msk.f32.vlgmr.msra.gmra.mxu1 %vm220_vm0, %v384_v11 }
  0x98   : > { %v213_v12 = vpop.permute.xlu0 %212 }
  0x99   : > { %vm214_vm2 = vcmp.eq.s32.totalorder %v213_v12, %v202_v8 }
  0x9a   : > { %v385_v13 = vsel %vm214_vm2, 1.0, %v553_v10 }
  0x9b   : > { %386 = vmatmul.msk.f32.vlgmr.msra.gmra.mxu0 %vm220_vm0, %v385_v13 }
 0x10f   : > { %v264_v14 = vpop.f32.mrf.mxu1 }
 0x118   : > { %v241_v15 = vpop.f32.mrf.mxu0 }
 0x119   : > { %v265_v16 = vadd.f32 %v264_v14, %v241_v15 }
 0x11b   : > { %271 = vrot.lane.b32.xlu1 %v265_v16, %s554_s9 }
 0x18d   : > { %v272_v18 = vpop.permute.xlu1 %271 }
 0x18e   : > { %275 = vst.msk [vmem:[%s191_s24] sm:$0xff] %vm274_vm4, %v272_v18 }
 0x18f   : > { %507 = shalt.err (!%p504_p8)
}
 0x190   : > { %396 = dma.vmem_to_hbm [thread:$0]  (%p613_p5), %s290_s29, 128, %s292_s30, %s277_s4  }
 0x191 PF: > { %p408_p9 = scmp.ge.s32.totalorder %s546_s15, 2  ;;  %s303_s10 = sand.u32 1, %s534_s12  }
 0x192   : > { %s304_s17 = scalar_lea.sflag [#allocation4], %s303_s10 }
 0x193   : > { %p403_p10 = pnand %p408_p9, %p617_p6 }
 0x195   : > { %p404_p11 = pneg %p403_p10 }
 0x197   : > { %529 = dma.done.wait (%p404_p11), %s304_s17, 128  }
 0x198   : > { %531 = vsyncadd (%p404_p11), %s304_s17, 4294967168  ;;  %p14_p12 = scmp.ge.s32.totalorder %s600_s18, 4   ;;  %s686_s12 = smov %s538_s13 }
 0x199   : > { %s687_s13 = smov %s542_s14  ;;  %s688_s14 = smov %s611_s21 }
 0x19a   : > { %s689_s15 = smov %s600_s18  ;;  %16 = sbr.rel (!%p14_p12) target bundleno = 4 (0x4), region = 76 }
 0x19f   :  { %310 = vsyncpa [#allocation3], 1 }
 0x1a0   :  { %312 = vsyncpa [#allocation3 + $0x1], 1 }
 0x1a1   :  { %313 = vsyncpa [#allocation4], 1 }
 0x1a2   :  { %315 = vsyncpa [#allocation4 + $0x1], 1 }

</bundles_post_ra>
